<compile_context>
chip_gen: v7x
topology: tpu7x:2x2x1
jax: 0.10.0
libtpu: 0.0.40
codegen_flags: <defaults>
</compile_context>

<pallas_src>
import jax
import jax.numpy as jnp
from jax.experimental import pallas as pl
from jax.experimental.pallas import tpu as pltpu

IN_DIM = 64
HID_DIM = 128
OUT_DIM = 64
BATCH_QUANTUM = 16       # bf16 packs 16 rows per vreg sublane group
DEFAULT_BLOCK_B = 4096   # batch rows per grid step (fits v5e/v6e/v7x VMEM defaults)


def _round_up(n, m):
    return ((n + m - 1) // m) * m


def chess_ai_kernel(x_ref, w1_ref, b1_ref, w2_ref, b2_ref, o_ref):
    # In-kernel f32 -> bf16 cast of the activation tile (VPU slack, no HBM cost).
    x_bf = x_ref[...].astype(jnp.bfloat16)
    # fc1 (bf16 operands, f32 accumulate on the MXU) + bias + ReLU in f32.
    h = jnp.dot(x_bf, w1_ref[...], preferred_element_type=jnp.float32)
    h = jnp.maximum(h + b1_ref[...], 0.0)           # b1_ref: (1, HID_DIM) f32
    # fc2 (cast hidden back to bf16 for the MXU; intended precision tradeoff).
    y = jnp.dot(h.astype(jnp.bfloat16), w2_ref[...],
                preferred_element_type=jnp.float32)
    o_ref[...] = (y + b2_ref[...]).astype(o_ref.dtype)   # compact (tb, OUT_DIM)


def prepare_params(w1, b1, w2, b2):
    """One-time weight prep (hoisted out of the per-call hot path).

    w1: (64,128), b1: (128,), w2: (128,64), b2: (64,)  -- all f32,
    stored as (in_features, out_features) = PyTorch weight transposed.
    """
    w1_bf = w1.astype(jnp.bfloat16)
    w2_bf = w2.astype(jnp.bfloat16)
    b1_2d = b1.reshape(1, HID_DIM).astype(jnp.float32)
    b2_2d = b2.reshape(1, OUT_DIM).astype(jnp.float32)
    return w1_bf, b1_2d, w2_bf, b2_2d


def chess_ai_forward(x, params, *, block_b=DEFAULT_BLOCK_B):
    """x: (B, 64) f32; params: output of prepare_params(). Returns (B, 64) f32.

    For very small B the fixed Pallas launch cost dominates and plain XLA
    fusion would be cheaper; this path targets large-batch evaluation but
    remains correct for any B.
    """
    w1_bf, b1_2d, w2_bf, b2_2d = params
    B = x.shape[0]

    # Pad batch only to a small quantum (<=15 wasted rows), never to the tile.
    b_pad = _round_up(B, BATCH_QUANTUM)
    if b_pad != B:
        x = jnp.pad(x, ((0, b_pad - B), (0, 0)))

    block_b = _round_up(block_b, BATCH_QUANTUM)
    tb = min(block_b, b_pad)
    # Partial last tile is fine: compute is row-independent, OOB writes masked.
    grid = (pl.cdiv(b_pad, tb),)

    cost = pl.CostEstimate(
        flops=2 * b_pad * (IN_DIM * HID_DIM + HID_DIM * OUT_DIM),
        transcendentals=0,
        bytes_accessed=(b_pad * IN_DIM * 4            # x (f32) in
                        + b_pad * OUT_DIM * 4         # y (f32) out
                        + IN_DIM * HID_DIM * 2        # w1 (bf16)
                        + HID_DIM * OUT_DIM * 2       # w2 (bf16)
                        + HID_DIM * 4 + OUT_DIM * 4), # biases (f32)
    )

    out = pl.pallas_call(
        chess_ai_kernel,
        out_shape=jax.ShapeDtypeStruct((b_pad, OUT_DIM), jnp.float32),
        grid=grid,
        in_specs=[
            pl.BlockSpec((tb, IN_DIM), lambda i: (i, 0)),          # x tile streams
            pl.BlockSpec((IN_DIM, HID_DIM), lambda i: (0, 0)),     # w1 resident
            pl.BlockSpec((1, HID_DIM), lambda i: (0, 0)),          # b1 resident
            pl.BlockSpec((HID_DIM, OUT_DIM), lambda i: (0, 0)),    # w2 resident
            pl.BlockSpec((1, OUT_DIM), lambda i: (0, 0)),          # b2 resident
        ],
        out_specs=pl.BlockSpec((tb, OUT_DIM), lambda i: (i, 0)),
        compiler_params=pltpu.CompilerParams(
            dimension_semantics=("parallel",)),
        cost_estimate=cost,
    )(x, w1_bf, b1_2d, w2_bf, b2_2d)

    return out[:B] if b_pad != B else out


def init_params(key):
    """Deterministic init mimicking nn.Linear's uniform(-1/sqrt(in), 1/sqrt(in))."""
    k1, k2, k3, k4 = jax.random.split(key, 4)
    bound1 = 1.0 / jnp.sqrt(IN_DIM)
    bound2 = 1.0 / jnp.sqrt(HID_DIM)
    # Stored as (in_features, out_features) = PyTorch weight transposed.
    w1 = jax.random.uniform(k1, (IN_DIM, HID_DIM), jnp.float32, -bound1, bound1)
    b1 = jax.random.uniform(k2, (HID_DIM,), jnp.float32, -bound1, bound1)
    w2 = jax.random.uniform(k3, (HID_DIM, OUT_DIM), jnp.float32, -bound2, bound2)
    b2 = jax.random.uniform(k4, (OUT_DIM,), jnp.float32, -bound2, bound2)
    return w1, b1, w2, b2


if __name__ == "__main__":
    key = jax.random.PRNGKey(0)
    k_x, k_p = jax.random.split(key)

    batch = 8
    x = jax.random.normal(k_x, (batch, IN_DIM), jnp.float32)
    w1, b1, w2, b2 = init_params(k_p)

    params = prepare_params(w1, b1, w2, b2)   # one-time prep, out of hot path
    out = chess_ai_forward(x, params)
    out = jax.block_until_ready(out)

    # Reference in plain JAX (same math as the PyTorch forward, full f32).
    # Tolerance loosened because the kernel uses bf16 MXU operands with f32
    # accumulation (intended precision tradeoff).
    ref = jnp.maximum(x @ w1 + b1, 0.0) @ w2 + b2
    assert out.shape == (batch, OUT_DIM)
    assert jnp.allclose(out, ref, atol=3e-2, rtol=3e-2), (
        float(jnp.max(jnp.abs(out - ref))))

    print("KERNEL_OK")
</pallas_src>

<mosaic_0001>
module attributes {stable_mosaic.version = 11 : i64} {
  func.func @chess_ai_kernel(%arg0: i32, %arg1: memref<16x64xf32, #tpu.memory_space<vmem>>, %arg2: memref<64x128xbf16, #tpu.memory_space<vmem>>, %arg3: memref<1x128xf32, #tpu.memory_space<vmem>>, %arg4: memref<128x64xbf16, #tpu.memory_space<vmem>>, %arg5: memref<1x64xf32, #tpu.memory_space<vmem>>, %arg6: memref<16x64xf32, #tpu.memory_space<vmem>>) attributes {dimension_semantics = [#tpu.dimension_semantics<parallel>], iteration_bounds = array<i64: 1>, scalar_prefetch = 0 : i64, scratch_operands = 0 : i64, tpu.core_type = #tpu.core_type<tc>, window_params = [{transform_indices = @transform_0, window_bounds = array<i64: 16, 64>}, {pipeline_mode = #tpu.pipeline_mode<synchronous>, transform_indices = @transform_1, window_bounds = array<i64: 64, 128>}, {pipeline_mode = #tpu.pipeline_mode<synchronous>, transform_indices = @transform_2, window_bounds = array<i64: 1, 128>}, {pipeline_mode = #tpu.pipeline_mode<synchronous>, transform_indices = @transform_3, window_bounds = array<i64: 128, 64>}, {pipeline_mode = #tpu.pipeline_mode<synchronous>, transform_indices = @transform_4, window_bounds = array<i64: 1, 64>}, {transform_indices = @transform_5, window_bounds = array<i64: 16, 64>}]} {
    %c0 = arith.constant 0 : index
    %c0_0 = arith.constant 0 : index
    %0 = vector.load %arg1[%c0, %c0_0] : memref<16x64xf32, #tpu.memory_space<vmem>>, vector<16x64xf32>
    %1 = arith.truncf %0 : vector<16x64xf32> to vector<16x64xbf16>
    %c0_1 = arith.constant 0 : index
    %c0_2 = arith.constant 0 : index
    %2 = vector.load %arg2[%c0_1, %c0_2] : memref<64x128xbf16, #tpu.memory_space<vmem>>, vector<64x128xbf16>
    %cst = arith.constant dense<0.000000e+00> : vector<16x128xf32>
    %3 = tpu.matmul %1, %2, %cst {dimension_numbers = #tpu.dot_dimension_numbers<[1], [0], [0], [1], [0, 0, 1, 1], [], []>} : vector<16x64xbf16>, vector<64x128xbf16>, vector<16x128xf32> -> vector<16x128xf32>
    %c0_3 = arith.constant 0 : index
    %c0_4 = arith.constant 0 : index
    %4 = vector.load %arg3[%c0_3, %c0_4] : memref<1x128xf32, #tpu.memory_space<vmem>>, vector<1x128xf32>
    %5 = vector.broadcast %4 : vector<1x128xf32> to vector<16x128xf32>
    %6 = arith.addf %3, %5 : vector<16x128xf32>
    %cst_5 = arith.constant 0.000000e+00 : f32
    %7 = vector.broadcast %cst_5 : f32 to vector<16x128xf32>
    %8 = arith.maximumf %6, %7 : vector<16x128xf32>
    %9 = arith.truncf %8 : vector<16x128xf32> to vector<16x128xbf16>
    %c0_6 = arith.constant 0 : index
    %c0_7 = arith.constant 0 : index
    %10 = vector.load %arg4[%c0_6, %c0_7] : memref<128x64xbf16, #tpu.memory_space<vmem>>, vector<128x64xbf16>
    %cst_8 = arith.constant dense<0.000000e+00> : vector<16x64xf32>
    %11 = tpu.matmul %9, %10, %cst_8 {dimension_numbers = #tpu.dot_dimension_numbers<[1], [0], [0], [1], [0, 0, 1, 1], [], []>} : vector<16x128xbf16>, vector<128x64xbf16>, vector<16x64xf32> -> vector<16x64xf32>
    %c0_9 = arith.constant 0 : index
    %c0_10 = arith.constant 0 : index
    %12 = vector.load %arg5[%c0_9, %c0_10] : memref<1x64xf32, #tpu.memory_space<vmem>>, vector<1x64xf32>
    %13 = vector.broadcast %12 : vector<1x64xf32> to vector<16x64xf32>
    %14 = arith.addf %11, %13 : vector<16x64xf32>
    %c0_11 = arith.constant 0 : index
    %c0_12 = arith.constant 0 : index
    %15 = vector.load %arg6[%c0_11, %c0_12] : memref<16x64xf32, #tpu.memory_space<vmem>>, vector<16x64xf32>
    tpu.vector_store %arg6[%c0_11, %c0_12], %14 {strides = array<i32>} : memref<16x64xf32, #tpu.memory_space<vmem>>, vector<16x64xf32>,
    return
  }
  func.func @transform_0(%arg0: i32) -> (i32, i32) {
    %c0_i32 = arith.constant 0 : i32
    %c0_i32_0 = arith.constant 0 : i32
    return %arg0, %c0_i32 : i32, i32
  }
  func.func @transform_1(%arg0: i32) -> (i32, i32) {
    %c0_i32 = arith.constant 0 : i32
    %c0_i32_0 = arith.constant 0 : i32
    %c0_i32_1 = arith.constant 0 : i32
    return %c0_i32, %c0_i32_0 : i32, i32
  }
  func.func @transform_2(%arg0: i32) -> (i32, i32) {
    %c0_i32 = arith.constant 0 : i32
    %c0_i32_0 = arith.constant 0 : i32
    %c0_i32_1 = arith.constant 0 : i32
    return %c0_i32, %c0_i32_0 : i32, i32
  }
  func.func @transform_3(%arg0: i32) -> (i32, i32) {
    %c0_i32 = arith.constant 0 : i32
    %c0_i32_0 = arith.constant 0 : i32
    %c0_i32_1 = arith.constant 0 : i32
    return %c0_i32, %c0_i32_0 : i32, i32
  }
  func.func @transform_4(%arg0: i32) -> (i32, i32) {
    %c0_i32 = arith.constant 0 : i32
    %c0_i32_0 = arith.constant 0 : i32
    %c0_i32_1 = arith.constant 0 : i32
    return %c0_i32, %c0_i32_0 : i32, i32
  }
  func.func @transform_5(%arg0: i32) -> (i32, i32) {
    %c0_i32 = arith.constant 0 : i32
    %c0_i32_0 = arith.constant 0 : i32
    return %arg0, %c0_i32 : i32, i32
  }
}

</mosaic_0001>

<bundles_post_ra>
// kernel: tpu_custom_call.1
= control target key start
LH: loop header
LB: loop body
LE: loop exit
PB: predicated region body
PF: predicated region fallthrough
CT: control target
= control target key end

     0   :  { %v344_v1 = vmov 0.0   ;;  %vm345_vm0 = vmmov 0   ;;  %s442_s0 = inlined_call_operand.vmem [shape: f32[16,64], index: 0, kind: input, shape index: {}]   ;;  %s443_s1 = inlined_call_operand.vmem [shape: bf16[64,128], index: 1, kind: input, shape index: {}]   ;;  %s444_s2 = inlined_call_operand.vmem [shape: f32[1,128], index: 2, kind: input, shape index: {}]   ;;  %s445_s3 = inlined_call_operand.vmem [shape: bf16[128,64], index: 3, kind: input, shape index: {}]   ;;  %s446_s4 = inlined_call_operand.vmem [shape: f32[1,64], index: 4, kind: input, shape index: {}]   ;;  %s447_s5 = inlined_call_operand.hbm [shape: f32[16,64], index: 5, kind: output, shape index: {}]  }
   0x1   :  { %v308_v0 = vld [vmem:[%s443_s1] sm:$0xff]   ;;  %271 = vmatprep.subr.bf16.mxu0 %v344_v1  ;;  %283 = vmatprep.subr.bf16.mxu1 %v344_v1  ;;  %v309_v2 = vld [vmem:[%s443_s1 + $0x8] sm:$0xff]   ;;  %v310_v4 = vld [vmem:[%s443_s1 + $0x10] sm:$0xff]  }
   0x2   :  { %272 = vmatpush3.bf16.msra.mxu0 %v308_v0  ;;  %279 = vmatprep.mubr.msk.bf16.mxu0 %vm345_vm0, %v344_v1  ;;  %v312_v3 = vld [vmem:[%s445_s3] sm:$0xff]   ;;  %v313_v5 = vld [vmem:[%s445_s3 + $0x8] sm:$0xff]   ;;  %v311_v6 = vld [vmem:[%s443_s1 + $0x18] sm:$0xff]  }
   0x3   :  { %273 = vmatprep.subr.bf16.mxu0 %v344_v1  ;;  %299 = vmatprep.mubr.msk.bf16.mxu1 %vm345_vm0, %v344_v1  ;;  %v22_v7 = vld [vmem:[%s442_s0] sm:$0xff]  ;;  %v23_v8 = vld [vmem:[%s442_s0 + $0x8] sm:$0xff]  ;;  %v314_v9 = vld [vmem:[%s445_s3 + $0x10] sm:$0xff]  }
   0x4   :  { %284 = vmatpush3.bf16.msra.mxu1 %v312_v3 }
   0x5   :  { %285 = vmatprep.subr.bf16.mxu1 %v344_v1 }
   0x6   :  { %274 = vmatpush3.bf16.msra.mxu0 %v309_v2 }
   0x7   :  { %275 = vmatprep.subr.bf16.mxu0 %v344_v1 }
   0x8   :  { %286 = vmatpush3.bf16.msra.mxu1 %v313_v5 }
   0x9   :  { %287 = vmatprep.subr.bf16.mxu1 %v344_v1 }
   0xa   :  { %276 = vmatpush3.bf16.msra.mxu0 %v310_v4 }
   0xb   :  { %277 = vmatprep.subr.bf16.mxu0 %v344_v1 }
   0xc   :  { %10 = vsyncpa [#allocation3], 0  ;;  %v24_v10 = vpack.c.bf16 %v23_v8, %v22_v7  ;;  %vm64_vm1 = vcmask 523264   ;;  %288 = vmatpush3.bf16.msra.mxu1 %v314_v9  ;;  %v315_v11 = vld [vmem:[%s445_s3 + $0x18] sm:$0xff]   ;;  %v316_v12 = vld [vmem:[%s445_s3 + $0x20] sm:$0xff]  }
   0xd   :  { %289 = vmatprep.subr.bf16.mxu1 %v344_v1  ;;  %v317_v13 = vld [vmem:[%s445_s3 + $0x28] sm:$0xff]   ;;  %v318_v14 = vld [vmem:[%s445_s3 + $0x30] sm:$0xff]   ;;  %v319_v15 = vld [vmem:[%s445_s3 + $0x38] sm:$0xff]   ;;  %s346_s3 = smov [#allocation2]  }
   0xe   :  { %278 = vmatpush3.bf16.msra.mxu0 %v311_v6  ;;  %v242_v16 = vld [vmem:[%s444_s2] ss:$0 sm:$0xff]  ;;  %s231_s23 = sshll.u32 %s346_s3, 4  ;;  %s232_s23 = int_to_ptr.vmem [resolvable:$true] %s231_s23 }
   0xf   :  { %v248_v26 = vld [vmem:[%s446_s4] ss:$0 sm:$0xff]  ;;  %s320_s2 = scalar_lea.vmem %s232_s23, 256  ;;  %p325_p1 = scmp.lt.s32.totalorder %s232_s23, %s232_s23 }
  0x10   :  { %290 = vmatpush3.bf16.msra.mxu1 %v315_v11  ;;  %p321_p0 = scmp.ne.s32.totalorder %s232_s23, %s320_s2  ;;  %p326_p2 = scmp.lt.s32.totalorder %s320_s2, %s320_s2 }
  0x11   :  { %280 = vmatmul.mubr.msk.bf16.vlgmr.msra.gmra.mrb[0].mxu0 %vm64_vm1, %v24_v10  ;;  %291 = vmatprep.subr.bf16.mxu1 %v344_v1 }
  0x12   :  { %p327_p3 = por %p326_p2, %p325_p1 }
  0x14   :  { %292 = vmatpush3.bf16.msra.mxu1 %v316_v12  ;;  %p328_p4 = pnand %p327_p3, %p321_p0 }
  0x15   :  { %293 = vmatprep.subr.bf16.mxu1 %v344_v1 }
  0x18   :  { %294 = vmatpush3.bf16.msra.mxu1 %v317_v13 }
  0x19   :  { %295 = vmatprep.subr.bf16.mxu1 %v344_v1 }
  0x1c   :  { %296 = vmatpush3.bf16.msra.mxu1 %v318_v14 }
  0x1d   :  { %297 = vmatprep.subr.bf16.mxu1 %v344_v1 }
  0x20   :  { %298 = vmatpush3.bf16.msra.mxu1 %v319_v15 }
  0xe4   :  { %v102_v17 = vpop.f32.mrb[0].mxu0 }
  0xe5   :  { %v103_v18 = vadd.f32 %v242_v16, %v102_v17  ;;  %v281_v19 = vpop.f32.mrb[1].mxu0 }
  0xe6   :  { %v105_v20 = vpop.f32.mrb[2].mxu0 }
  0xe7   :  { %v106_v21 = vadd.f32 %v242_v16, %v105_v20  ;;  %v282_v22 = vpop.f32.mrb[3].mxu0  ;;  %v109_v23 = vmax.f32 %v103_v18, 0.0 }
  0xe9   :  { %v110_v24 = vmax.f32 %v106_v21, 0.0 }
  0xeb   :  { %v111_v25 = vpack.c.bf16 %v110_v24, %v109_v23 }
  0xed   :  { %300 = vmatmul.mubr.bf16.vlgmr.msra.gmra.mrb[0].mxu1 %v111_v25 }
 0x1c0   :  { %v217_v27 = vpop.f32.mrb[0].mxu1 }
 0x1c1   :  { %v218_v28 = vadd.f32 %v248_v26, %v217_v27  ;;  %v301_v29 = vpop.f32.mrb[1].mxu1 }
 0x1c2   :  { %v220_v30 = vpop.f32.mrb[2].mxu1 }
 0x1c3   :  { %224 = vst.msk [vmem:[#allocation2] sm:$0xff] %vm64_vm1, %v218_v28  ;;  %v221_v31 = vadd.f32 %v248_v26, %v220_v30  ;;  %v302_v32 = vpop.f32.mrb[3].mxu1 }
 0x1c5   :  { %225 = vst.msk [vmem:[#allocation2 + $0x8] sm:$0xff] %vm64_vm1, %v221_v31 }
 0x1c6   :  { %331 = shalt.err (!%p328_p4)
}
 0x1c7   :  { %s332_s25 = scalar_lea.hbm %s447_s5, 256 }
 0x1c8   :  { %p333_p5 = scmp.ne.s32.totalorder %s447_s5, %s332_s25  ;;  %p336_p6 = scmp.lt.u32.totalorder %s332_s25, %s447_s5 }
 0x1ca   :  { %p338_p7 = pnand %p336_p6, %p333_p5 }
 0x1cc   :  { %341 = shalt.err (!%p338_p7)
}
 0x1cd   :  { %s347_s30 = smov 128   ;;  %s348_s6 = smov 8  }
 0x1ce   :  { %237 = dma.vmem_to_hbm [thread:$0]  %s232_s23, 256, %s447_s5, [#allocation3], %s347_s30, %s347_s30, %s348_s6  }
 0x1cf   :  { %342 = dma.done.wait [#allocation3], 256  }
 0x1d0   :  { %343 = vsyncadd [#allocation3], 4294967040 }
 0x1d1   :  { %241 = vsyncpa [#allocation3], 1 }

</bundles_post_ra>
